<compile_context>
chip_gen: v7x
topology: tpu7x:2x2x1
jax: 0.10.0
libtpu: 0.0.40
codegen_flags: <defaults>
</compile_context>

<pallas_src>
import functools

import jax
import jax.numpy as jnp
from jax.experimental import pallas as pl
from jax.experimental.pallas import tpu as pltpu

_SCALE = 1.0 / 0.6
_LANES = 128


def _chip_config():
    """Per-generation block size / VMEM budget / compute-dtype policy."""
    try:
        kind = jax.devices()[0].device_kind.lower()
    except Exception:
        kind = ""
    if "v5 lite" in kind or "v5e" in kind or "v5litepod" in kind:
        # v5e: default scoped VMEM is 16 MiB; 4 MiB blocks (16 MiB
        # double-buffered) need the limit raised.  No bf16 VPU/EUP -> f32.
        return dict(block_bytes=4 << 20, vmem_limit=32 << 20, min_steps=2,
                    bf16_compute=False)
    if "v6" in kind or "trillium" in kind:
        # v6e: 128 MiB physical VMEM; 8 MiB blocks = 32 MiB double-buffered.
        return dict(block_bytes=8 << 20, vmem_limit=48 << 20, min_steps=2,
                    bf16_compute=True)
    if "v7" in kind:
        # v7x: 64 MiB physical / 32 MiB default scoped; 6 MiB blocks
        # (24 MiB double-buffered); 2 TensorCores -> keep >=4 grid steps.
        return dict(block_bytes=6 << 20, vmem_limit=48 << 20, min_steps=4,
                    bf16_compute=True)
    # Unknown / older chips: conservative defaults.
    return dict(block_bytes=4 << 20, vmem_limit=32 << 20, min_steps=2,
                bf16_compute=False)


def _silu_scaled_math(x, compute_dtype, out_dtype):
    xc = x.astype(compute_dtype)
    # sigmoid(x) = 0.5 * (tanh(0.5 x) + 1): tanh is an EUP op (separate
    # bundle slot), avoids a true divide lowering to VALU Newton reciprocal.
    s = 0.5 * (jnp.tanh(0.5 * xc) + 1.0)
    return (xc * s * _SCALE).astype(out_dtype)


def _scaled_silu_kernel(x_ref, o_ref, *, compute_dtype):
    o_ref[...] = _silu_scaled_math(x_ref[...], compute_dtype, o_ref.dtype)


def scaled_silu(x: jax.Array, *, donate_input: bool = False) -> jax.Array:
    """Elementwise SiLU(x) / 0.6, matching torch.nn.SiLU()(x) * (1 / 0.6)."""
    orig_shape = x.shape
    orig_dtype = x.dtype
    n = x.size
    if n == 0:
        return x

    cfg = _chip_config()
    compute_dtype = (jnp.bfloat16
                     if (cfg["bf16_compute"] and orig_dtype == jnp.bfloat16)
                     else jnp.float32)
    itemsize = jnp.dtype(orig_dtype).itemsize

    flat = x.reshape(-1)
    n_aligned = (n // _LANES) * _LANES
    if n_aligned == 0:
        # Tiny (<128 elements): not worth a kernel launch.
        return _silu_scaled_math(x, compute_dtype, orig_dtype)

    rows = n_aligned // _LANES
    head = flat[:n_aligned].reshape(rows, _LANES)

    # Block sizing: as big as the per-chip budget allows (amortizes the
    # ~0.35us/step grid overhead) but never so big that the grid collapses
    # below min_steps (keeps double-buffering and both v7x TCs busy).
    desired = max(8, (cfg["block_bytes"] // (_LANES * itemsize)) // 8 * 8)
    min_steps = cfg["min_steps"]
    if rows <= 8:
        row_tile = rows            # single full-extent block (always legal)
    elif rows < 8 * min_steps:
        row_tile = 8               # small array: keep the pipeline >=2 deep
    else:
        cap = max(8, (rows // min_steps) // 8 * 8)
        row_tile = min(desired, cap)
    grid = (pl.cdiv(rows, row_tile),)

    cost = pl.CostEstimate(
        flops=4 * n_aligned,
        transcendentals=n_aligned,
        bytes_accessed=2 * n_aligned * itemsize,
    )

    kernel = functools.partial(_scaled_silu_kernel, compute_dtype=compute_dtype)
    out_head = pl.pallas_call(
        kernel,
        out_shape=jax.ShapeDtypeStruct((rows, _LANES), orig_dtype),
        grid_spec=pltpu.PrefetchScalarGridSpec(
            num_scalar_prefetch=0,
            grid=grid,
            in_specs=[pl.BlockSpec((row_tile, _LANES), lambda i: (i, 0))],
            out_specs=pl.BlockSpec((row_tile, _LANES), lambda i: (i, 0)),
        ),
        compiler_params=pltpu.CompilerParams(
            dimension_semantics=("parallel",),
            vmem_limit_bytes=cfg["vmem_limit"],
        ),
        cost_estimate=cost,
        input_output_aliases=({0: 0} if donate_input else {}),
    )(head)

    if n_aligned == n:
        return out_head.reshape(orig_shape)

    # Non-128-aligned tail (<128 elements): plain jnp on the remainder
    # instead of padding/unpadding the whole array (no doubled HBM traffic).
    out_tail = _silu_scaled_math(flat[n_aligned:], compute_dtype, orig_dtype)
    return jnp.concatenate([out_head.reshape(-1), out_tail]).reshape(orig_shape)


if __name__ == "__main__":
    key = jax.random.PRNGKey(0)

    # NCHW-style conv activation, lane-aligned path (2*4*16*16 = 2048 elems).
    x = jax.random.normal(key, (2, 4, 16, 16), dtype=jnp.float32)
    out = scaled_silu(x)
    jax.block_until_ready(out)
    ref = jax.nn.silu(x) * (1.0 / 0.6)
    assert out.shape == x.shape and out.dtype == x.dtype
    assert jnp.allclose(out, ref, atol=1e-4, rtol=1e-4)

    # Non-128-aligned path with a kernel head + jnp tail (5*37 = 185 elems).
    x_odd = jax.random.normal(jax.random.PRNGKey(1), (5, 37), dtype=jnp.float32)
    out_odd = scaled_silu(x_odd)
    jax.block_until_ready(out_odd)
    assert jnp.allclose(out_odd, jax.nn.silu(x_odd) * (1.0 / 0.6),
                        atol=1e-4, rtol=1e-4)

    # bf16 path (native bf16 compute on v6e/v7x, f32 compute on v5e).
    x_bf16 = jax.random.normal(jax.random.PRNGKey(2), (2, 8, 32),
                               dtype=jnp.bfloat16)
    out_bf16 = scaled_silu(x_bf16)
    jax.block_until_ready(out_bf16)
    ref_bf16 = jax.nn.silu(x_bf16.astype(jnp.float32)) * (1.0 / 0.6)
    assert out_bf16.dtype == jnp.bfloat16
    assert jnp.allclose(out_bf16.astype(jnp.float32), ref_bf16,
                        atol=2e-2, rtol=2e-2)

    print("KERNEL_OK")
</pallas_src>

<mosaic_0001>
module attributes {stable_mosaic.version = 11 : i64} {
  func.func @_scaled_silu_kernel(%arg0: i32, %arg1: memref<8x128xf32, #tpu.memory_space<vmem>>, %arg2: memref<8x128xf32, #tpu.memory_space<vmem>>) attributes {dimension_semantics = [#tpu.dimension_semantics<parallel>], iteration_bounds = array<i64: 2>, scalar_prefetch = 0 : i64, scratch_operands = 0 : i64, tpu.core_type = #tpu.core_type<tc>, window_params = [{transform_indices = @transform_0, window_bounds = array<i64: 8, 128>}, {transform_indices = @transform_1, window_bounds = array<i64: 8, 128>}]} {
    %c0 = arith.constant 0 : index
    %c0_0 = arith.constant 0 : index
    %0 = vector.load %arg1[%c0, %c0_0] : memref<8x128xf32, #tpu.memory_space<vmem>>, vector<8x128xf32>
    %cst = arith.constant 5.000000e-01 : f32
    %1 = vector.broadcast %cst : f32 to vector<8x128xf32>
    %2 = arith.mulf %1, %0 : vector<8x128xf32>
    %3 = math.tanh %2 : vector<8x128xf32>
    %cst_1 = arith.constant 1.000000e+00 : f32
    %4 = vector.broadcast %cst_1 : f32 to vector<8x128xf32>
    %5 = arith.addf %3, %4 : vector<8x128xf32>
    %cst_2 = arith.constant 5.000000e-01 : f32
    %6 = vector.broadcast %cst_2 : f32 to vector<8x128xf32>
    %7 = arith.mulf %6, %5 : vector<8x128xf32>
    %8 = arith.mulf %0, %7 : vector<8x128xf32>
    %cst_3 = arith.constant 1.66666663 : f32
    %9 = vector.broadcast %cst_3 : f32 to vector<8x128xf32>
    %10 = arith.mulf %8, %9 : vector<8x128xf32>
    %c0_4 = arith.constant 0 : index
    %c0_5 = arith.constant 0 : index
    %11 = vector.load %arg2[%c0_4, %c0_5] : memref<8x128xf32, #tpu.memory_space<vmem>>, vector<8x128xf32>
    tpu.vector_store %arg2[%c0_4, %c0_5], %10 {strides = array<i32>} : memref<8x128xf32, #tpu.memory_space<vmem>>, vector<8x128xf32>,
    return
  }
  func.func @transform_0(%arg0: i32) -> (i32, i32) {
    %c0_i32 = arith.constant 0 : i32
    %c0_i32_0 = arith.constant 0 : i32
    return %arg0, %c0_i32 : i32, i32
  }
  func.func @transform_1(%arg0: i32) -> (i32, i32) {
    %c0_i32 = arith.constant 0 : i32
    %c0_i32_0 = arith.constant 0 : i32
    return %arg0, %c0_i32 : i32, i32
  }
}

</mosaic_0001>

<bundles_post_ra>
// kernel: tpu_custom_call.1
= control target key start
LH: loop header
LB: loop body
LE: loop exit
PB: predicated region body
PF: predicated region fallthrough
CT: control target
= control target key end

     0   :  { %6 = vsyncpa [#allocation3], 0  ;;  %s555_s0 = inlined_call_operand.hbm [shape: f32[16,128], index: 0, kind: input, shape index: {}]   ;;  %s556_s1 = inlined_call_operand.hbm [shape: f32[16,128], index: 1, kind: output, shape index: {}]  }
   0x1   :  { %8 = vsyncpa [#allocation3 + $0x1], 0 }
   0x2   :  { %9 = vsyncpa [#allocation4], 0 }
   0x3   :  { %11 = vsyncpa [#allocation4 + $0x1], 0  ;;  %s394_s6 = smov 0   ;;  %s396_s7 = smov 0  }
   0x4   :  { %s398_s8 = smov 0   ;;  %s400_s9 = smov 0  }
   0x5 LB: > { %s415_s10 = sadd.s32 4294967295, %s380_s9   ;;  %s224_s11 = sadd.s32 4294967294, %s380_s9   ;;  %s380_s9 = sphi %s400_s9, %s571_s9   ;;  %s376_s8 = sphi %s398_s8, %s570_s8   ;;  %s372_s7 = sphi %s396_s7, %s569_s7   ;;  %s368_s6 = sphi %s394_s6, %s568_s6  }
   0x6   : > { %s419_s12 = sadd.s32 1, %s380_s9   ;;  %s24_s13 = sadd.s32 1, %s376_s8 }
   0x7   : > { %s21_s14 = ssub.s32 %s380_s9, %s419_s12  ;;  %p31_p0 = scmp.ne.s32.totalorder %s376_s8, %s372_s7 }
   0x8   : > { %p22_p1 = scmp.eq.s32.totalorder %s21_s14, 0  ;;  %p32_p2 = scmp.eq.s32.totalorder %s380_s9, 0 }
   0x9   : > { %p37_p3 = scmp.ne.s32.totalorder %s372_s7, %s368_s6  ;;  %p38_p4 = scmp.eq.s32.totalorder %s415_s10, 0 }
   0xa   : > { %s431_s15 = scalar_select %p22_p1, %s376_s8, %s24_s13  }
   0xb   : > { %p433_p5 = por %p32_p2, %p31_p0  ;;  %p437_p6 = por %p38_p4, %p37_p3 }
   0xc   : > { %p61_p7 = scmp.eq.s32.totalorder %s415_s10, 1  ;;  %p67_p8 = scmp.eq.s32.totalorder %s224_s11, 1 }
   0xd   : > { %p248_p10 = scmp.lt.s32.totalorder %s380_s9, 2  ;;  %s87_s20 = sand.u32 1, %s376_s8  }
   0xe   : > { %p444_p11 = por %p61_p7, %p31_p0  ;;  %p448_p12 = por %p67_p8, %p37_p3 }
   0xf   : > { %s228_s21 = sshll.u32 %s380_s9, 7  ;;  %s227_s22 = sshll.u32 %s87_s20, 3 }
  0x10   : > { %s560_s18 = scalar_select %p444_p11, 1, 0 }
  0x11   : > { %s561_s19 = scalar_select %p448_p12, 1, 0 }
  0x12   : > { %s457_s25 = scalar_lea.hbm %s555_s0, %s228_s21  ;;  %s91_s26 = scalar_lea.vmem [#allocation2], %s227_s22 }
  0x13   : > { %s98_s27 = sshll.u32 %s91_s26, 4  ;;  %p461_p13 = pnand %p248_p10, %p433_p5  ;;  %s465_s27 = int_to_ptr.vmem [resolvable:$true] %s98_s27 }
  0x14   : > { %s88_s29 = scalar_lea.sflag [#allocation3], %s87_s20  ;;  %s284_s30 = scalar_lea.hbm %s457_s25, 128 }
  0x15   : > { %p285_p2 = scmp.ne.s32.totalorder %s457_s25, %s284_s30  ;;  %p286_p3 = pneg %p461_p13 }
  0x16   : > { %s289_s4 = scalar_lea.hbm %s555_s0, 256  ;;  %p290_p5 = scmp.lt.u32.totalorder %s457_s25, %s555_s0 }
  0x17   : > { %p287_p4 = pnand %p286_p3, %p285_p2  ;;  %p291_p8 = scmp.lt.u32.totalorder %s289_s4, %s284_s30 }
  0x18   : > { %p293_p9 = scmp.lt.u32.totalorder %s284_s30, %s457_s25 }
  0x19   : > { %p288_p7 = pneg %p287_p4  ;;  %p292_p10 = por %p291_p8, %p290_p5 }
  0x1b   : > { %p294_p0 = por %p293_p9, %p292_p10 }
  0x1d   : > { %p295_p1 = pnand %p294_p0, %p288_p7 }
  0x1f   : > { %298 = shalt.err (!%p295_p1)
}
  0x20   : > { %s299_s13 = scalar_lea.vmem %s465_s27, 128  ;;  %s382_s14 = smov [#allocation2]  }
  0x21   : > { %p300_p2 = scmp.ne.s32.totalorder %s465_s27, %s299_s13  ;;  %s304_s16 = sshll.u32 %s382_s14, 4  ;;  %s305_s16 = int_to_ptr.vmem [resolvable:$false] %s304_s16 }
  0x22   : > { %s306_s20 = scalar_lea.vmem %s305_s16, 256  ;;  %p307_p11 = scmp.lt.s32.totalorder %s465_s27, %s305_s16 }
  0x23   : > { %p302_p4 = pnand %p300_p2, %p286_p3  ;;  %p308_p5 = scmp.lt.s32.totalorder %s306_s20, %s299_s13 }
  0x25   : > { %p303_p12 = pneg %p302_p4  ;;  %p309_p8 = por %p308_p5, %p307_p11 }
  0x27   : > { %p310_p9 = pnand %p309_p8, %p303_p12 }
  0x29   : > { %313 = shalt.err (!%p310_p9)
}
  0x2a   : > { %243 = dma.hbm_to_vmem [thread:$0]  (!%p461_p13), %s457_s25, 128, %s465_s27, %s88_s29  }
  0x2b   : > { %p563_p0 = scmp.lt.s32.totalorder %s380_s9, 3  ;;  %p564_p1 = scmp.ge.s32.totalorder %s380_s9, 1 }
  0x2d   : > { %p104_p3 = pnand %p564_p1, %p563_p0 }
  0x2e   : > { %s499_s21 = sand.u32 (!%p104_p3), 1, %s372_s7  }
  0x2f   : > { %107 = sbr.rel (%p104_p3) target bundleno = 91 (0x5b), region = 24  ;;  %s230_s22 = sshll.u32 (!%p104_p3), %s499_s21, 3 }
  0x30   : > { %s110_s23 = scalar_lea.sflag (!%p104_p3), [#allocation3], %s499_s21  ;;  %s113_s24 = scalar_lea.vmem (!%p104_p3), [#allocation2], %s230_s22 }
  0x36   : > { %359 = dma.done.wait (%p437_p6), %s110_s23, 128  }
  0x37   : > { %361 = vsyncadd (%p437_p6), %s110_s23, 4294967168  ;;  %v132_v0 = vld [vmem:[%s113_s24] sm:$0xff]  ;;  %s131_s25 = scalar_lea.vmem [#allocation5], %s230_s22  ;;  %s233_s27 = sshll.u32 %s415_s10, 7 }
  0x38   : > { %v133_v1 = vmul.f32 0.5, %v132_v0  ;;  %s154_s26 = sshll.u32 %s131_s25, 4  ;;  %s513_s17 = scalar_lea.hbm %s556_s1, %s233_s27  ;;  %s508_s26 = int_to_ptr.vmem [resolvable:$true] %s154_s26 }
  0x39   : > { %s141_s30 = scalar_lea.sflag [#allocation4], %s499_s21  ;;  %s314_s2 = scalar_lea.vmem %s508_s26, 128 }
  0x3a   : > { %282 = vtanh.f32 %v133_v1  ;;  %p315_p6 = scmp.ne.s32.totalorder %s508_s26, %s314_s2  ;;  %p565_p11 = scmp.ne.s32.totalorder %s560_s18, 0 }
  0x3b   : > { %s383_s10 = smov [#allocation5]  }
  0x3c   : > { %p316_p12 = pnand %p315_p6, %p565_p11  ;;  %s318_s3 = sshll.u32 %s383_s10, 4  ;;  %s319_s3 = int_to_ptr.vmem [resolvable:$false] %s318_s3 }
  0x3d   : > { %s320_s4 = scalar_lea.vmem %s319_s3, 256  ;;  %p321_p7 = scmp.lt.s32.totalorder %s508_s26, %s319_s3 }
  0x3e   : > { %p317_p13 = pneg %p316_p12  ;;  %p322_p10 = scmp.lt.s32.totalorder %s320_s4, %s314_s2 }
  0x40   : > { %p323_p2 = por %p322_p10, %p321_p7 }
  0x42   : > { %p324_p4 = pnand %p323_p2, %p317_p13 }
  0x44   : > { %v283_v2 = vpop.eup %282 }
  0x45   : > { %v135_v3 = vadd.f32 1.0, %v283_v2 }
  0x47   : > { %v136_v4 = vmul.f32 0.5, %v135_v3 }
  0x49   : > { %v137_v5 = vmul.f32 %v136_v4, %v132_v0 }
  0x4b   : > { %v138_v6 = vmul.f32 1.6666666, %v137_v5 }
  0x4d   : > { %139 = vst [vmem:[%s131_s25] sm:$0xff] %v138_v6 }
  0x4e   : > { %327 = shalt.err (!%p324_p4)
}
  0x4f   : > { %s328_s5 = scalar_lea.hbm %s513_s17, 128  ;;  %s332_s14 = scalar_lea.hbm %s556_s1, 256 }
  0x50   : > { %p329_p5 = scmp.ne.s32.totalorder %s513_s17, %s328_s5  ;;  %p333_p0 = scmp.lt.u32.totalorder %s513_s17, %s556_s1 }
  0x51   : > { %p334_p1 = scmp.lt.u32.totalorder %s332_s14, %s328_s5  ;;  %p336_p6 = scmp.lt.u32.totalorder %s328_s5, %s513_s17 }
  0x52   : > { %p330_p8 = pnand %p329_p5, %p565_p11 }
  0x53   : > { %p335_p3 = por %p334_p1, %p333_p0 }
  0x54   : > { %p331_p9 = pneg %p330_p8 }
  0x55   : > { %p337_p12 = por %p336_p6, %p335_p3 }
  0x57   : > { %p338_p13 = pnand %p337_p12, %p331_p9 }
  0x59   : > { %341 = shalt.err (!%p338_p13)
}
  0x5a   : > { %238 = dma.vmem_to_hbm [thread:$0]  (%p565_p11), %s508_s26, 128, %s513_s17, %s141_s30  }
  0x5b PF: > { %s166_s21 = sand.u32 1, %s368_s6   ;;  %p566_p7 = scmp.ne.s32.totalorder %s561_s19, 0 }
  0x5c   : > { %p567_p10 = scmp.ge.s32.totalorder %s380_s9, 2  ;;  %s167_s22 = scalar_lea.sflag [#allocation4], %s166_s21 }
  0x5e   : > { %p245_p2 = pnand %p567_p10, %p566_p7 }
  0x60   : > { %363 = dma.done.wait (!%p245_p2), %s167_s22, 128  }
  0x61   : > { %365 = vsyncadd (!%p245_p2), %s167_s22, 4294967168  ;;  %p14_p4 = scmp.ge.s32.totalorder %s419_s12, 4   ;;  %s568_s6 = smov %s372_s7 }
  0x62   : > { %s569_s7 = smov %s376_s8  ;;  %s570_s8 = smov %s431_s15 }
  0x63   : > { %s571_s9 = smov %s419_s12  ;;  %16 = sbr.rel (!%p14_p4) target bundleno = 5 (0x5), region = 69 }
  0x6a   :  { %172 = vsyncpa [#allocation3], 1 }
  0x6b   :  { %174 = vsyncpa [#allocation3 + $0x1], 1 }
  0x6c   :  { %175 = vsyncpa [#allocation4], 1 }
  0x6d   :  { %177 = vsyncpa [#allocation4 + $0x1], 1 }

</bundles_post_ra>
